<compile_context>
chip_gen: v5e
topology: v5e:2x2
jax: 0.10.0
libtpu: 0.0.40
codegen_flags: <defaults>
</compile_context>

<pallas_src>
import functools

import jax
import jax.numpy as jnp
from jax.experimental import pallas as pl
from jax.experimental.pallas import tpu as pltpu


def _conv_bn_kernel(x_ref, w_ref, gb_ref, o_ref, *, n_batch, p_valid, eps):
    # x_ref : (N, C, Pp)  NCHW input, spatial flattened + zero-padded to Pp lanes
    # w_ref : (C, C)      1x1 conv weight
    # gb_ref: (C, 2)      column 0 = gamma, column 1 = beta
    # o_ref : (N, C, Pp)
    w = w_ref[...]
    gamma = gb_ref[:, 0:1]
    beta = gb_ref[:, 1:2]

    c = w.shape[0]
    p_pad = x_ref.shape[-1]
    inv_count = 1.0 / float(n_batch * p_valid)   # static Python float

    # ---- pass 0: 1x1 conv as MXU matmul per batch; x-sums off the y-chain ----
    x_sum = jnp.zeros((c, 1), dtype=jnp.float32)
    ys = []
    for n in range(n_batch):                     # static unroll (N known at trace)
        x_n = x_ref[n]                           # (C, Pp)
        x_sum = x_sum + jnp.sum(x_n, axis=-1, keepdims=True)
        ys.append(jnp.dot(w, x_n, preferred_element_type=jnp.float32))

    # mean = E[W x] = W E[x]; padded lanes are zero so they contribute nothing.
    s = jnp.dot(w, x_sum, preferred_element_type=jnp.float32)   # (C, 1)
    mean = s * inv_count

    # ---- pass 1: centered variance (numerically safe), mask padded lanes ----
    if p_pad != p_valid:
        lane = jax.lax.broadcasted_iota(jnp.int32, (1, p_pad), 1)
        mask = lane < p_valid
    else:
        mask = None
    ssq = jnp.zeros((c, 1), dtype=jnp.float32)
    for n in range(n_batch):
        d = ys[n] - mean
        if mask is not None:
            d = jnp.where(mask, d, 0.0)
        ssq = ssq + jnp.sum(d * d, axis=-1, keepdims=True)
    var = ssq * inv_count                        # biased variance (PyTorch fwd)
    inv_std = jax.lax.rsqrt(var + eps)           # EUP

    # Fold the BN affine into one per-channel scale/bias -> one FMA per element.
    scale = gamma * inv_std
    bias = beta - mean * scale
    for n in range(n_batch):
        o_ref[n] = (ys[n] * scale + bias).astype(o_ref.dtype)


def conv2d_bn(x_nchw, weight, gamma, beta, *, eps=1e-5):
    N, C, H, W = x_nchw.shape
    P = H * W
    Pp = max(128, ((P + 127) // 128) * 128)      # lane-dense last dim

    # (N, C, H, W) -> (N, C, H*W): contiguity-preserving reshape (no HBM copy),
    # then zero-pad the lane dim so every vreg / store in the kernel is full.
    x3 = x_nchw.reshape(N, C, P)
    if Pp != P:
        x3 = jnp.pad(x3, ((0, 0), (0, 0), (0, Pp - P)))

    w2d = weight.reshape(C, C)
    gb = jnp.stack([gamma, beta], axis=1)        # (C, 2): single input, single DMA

    kernel = functools.partial(_conv_bn_kernel, n_batch=N, p_valid=P, eps=eps)

    out3 = pl.pallas_call(
        kernel,
        out_shape=jax.ShapeDtypeStruct((N, C, Pp), x_nchw.dtype),
        in_specs=[
            pl.BlockSpec(memory_space=pltpu.MemorySpace.VMEM),
            pl.BlockSpec(memory_space=pltpu.MemorySpace.VMEM),
            pl.BlockSpec(memory_space=pltpu.MemorySpace.VMEM),
        ],
        out_specs=pl.BlockSpec(memory_space=pltpu.MemorySpace.VMEM),
        cost_estimate=pl.CostEstimate(
            flops=2 * N * C * C * P,
            transcendentals=C,
            bytes_accessed=(2 * N * C * Pp + C * C + 2 * C) * 4,
        ),
    )(x3, w2d, gb)

    return out3[:, :, :P].reshape(N, C, H, W)


if __name__ == "__main__":
    key = jax.random.PRNGKey(0)
    kx, kw = jax.random.split(key)

    # Shapes from the PyTorch module: input (1, 48, 14, 14), Conv2d(48, 48, 1x1).
    N, C, H, W = 1, 48, 14, 14
    x = jax.random.normal(kx, (N, C, H, W), dtype=jnp.float32)

    # Conv2d(48, 48, 1x1, bias=False) weight: (48, 48, 1, 1)
    weight = (jax.random.normal(kw, (C, C, 1, 1), dtype=jnp.float32)
              * (1.0 / jnp.sqrt(jnp.float32(C))))
    # BatchNorm2d(48) affine params (PyTorch default init)
    gamma = jnp.ones((C,), dtype=jnp.float32)
    beta = jnp.zeros((C,), dtype=jnp.float32)

    fn = jax.jit(conv2d_bn)
    out = fn(x, weight, gamma, beta)
    out = jax.block_until_ready(out)

    # Pure-JAX reference (same math, computed outside Pallas).
    y_ref = jnp.einsum("oc,nchw->nohw", weight.reshape(C, C), x)
    mean = y_ref.mean(axis=(0, 2, 3), keepdims=True)
    var = ((y_ref - mean) ** 2).mean(axis=(0, 2, 3), keepdims=True)
    ref = gamma.reshape(1, C, 1, 1) * (y_ref - mean) / jnp.sqrt(var + 1e-5) \
        + beta.reshape(1, C, 1, 1)

    assert out.shape == (N, C, H, W)
    assert jnp.allclose(out, ref, atol=1e-4, rtol=1e-4), "mismatch vs reference"

    print("KERNEL_OK")
</pallas_src>

<mosaic_0001>
module attributes {stable_mosaic.version = 11 : i64} {
  func.func @_conv_bn_kernel(%arg0: memref<1x48x256xf32, #tpu.memory_space<vmem>>, %arg1: memref<48x48xf32, #tpu.memory_space<vmem>>, %arg2: memref<48x2xf32, #tpu.memory_space<vmem>>, %arg3: memref<1x48x256xf32, #tpu.memory_space<vmem>>) attributes {dimension_semantics = [], scalar_prefetch = 0 : i64, scratch_operands = 0 : i64, tpu.core_type = #tpu.core_type<tc>} {
    %c0 = arith.constant 0 : index
    %c0_0 = arith.constant 0 : index
    %0 = vector.load %arg1[%c0, %c0_0] : memref<48x48xf32, #tpu.memory_space<vmem>>, vector<48x48xf32>
    %c0_1 = arith.constant 0 : index
    %c0_2 = arith.constant 0 : index
    %1 = vector.load %arg2[%c0_1, %c0_2] : memref<48x2xf32, #tpu.memory_space<vmem>>, vector<48x1xf32>
    %c0_3 = arith.constant 0 : index
    %c1 = arith.constant 1 : index
    %2 = vector.load %arg2[%c0_3, %c1] : memref<48x2xf32, #tpu.memory_space<vmem>>, vector<48x1xf32>
    %cst = arith.constant 0.000000e+00 : f32
    %3 = vector.broadcast %cst : f32 to vector<48x1xf32>
    %c0_4 = arith.constant 0 : index
    %c0_5 = arith.constant 0 : index
    %c0_6 = arith.constant 0 : index
    %4 = vector.load %arg0[%c0_4, %c0_5, %c0_6] : memref<1x48x256xf32, #tpu.memory_space<vmem>>, vector<1x48x256xf32>
    %5 = vector.shape_cast %4 : vector<1x48x256xf32> to vector<48x256xf32>
    %cst_7 = arith.constant dense<0.000000e+00> : vector<48xf32>
    %6 = vector.multi_reduction <add>, %5, %cst_7 [1] : vector<48x256xf32> to vector<48xf32>
    %7 = vector.shape_cast %6 : vector<48xf32> to vector<48x1xf32>
    %8 = arith.addf %3, %7 : vector<48x1xf32>
    %cst_8 = arith.constant dense<0.000000e+00> : vector<48x256xf32>
    %9 = tpu.matmul %0, %5, %cst_8 {dimension_numbers = #tpu.dot_dimension_numbers<[1], [0], [0], [1], [0, 0, 1, 1], [], []>} : vector<48x48xf32>, vector<48x256xf32>, vector<48x256xf32> -> vector<48x256xf32>
    %cst_9 = arith.constant dense<0.000000e+00> : vector<48x1xf32>
    %10 = tpu.matmul %0, %8, %cst_9 {dimension_numbers = #tpu.dot_dimension_numbers<[1], [0], [0], [1], [0, 0, 1, 1], [], []>} : vector<48x48xf32>, vector<48x1xf32>, vector<48x1xf32> -> vector<48x1xf32>
    %cst_10 = arith.constant 0.00510204071 : f32
    %11 = vector.broadcast %cst_10 : f32 to vector<48x1xf32>
    %12 = arith.mulf %10, %11 : vector<48x1xf32>
    %13 = tpu.iota {dimensions = array<i32: 1>} : vector<1x256xi32>
    %c196_i32 = arith.constant 196 : i32
    %14 = vector.broadcast %c196_i32 : i32 to vector<1x256xi32>
    %15 = arith.cmpi slt, %13, %14 : vector<1x256xi32>
    %cst_11 = arith.constant 0.000000e+00 : f32
    %16 = vector.broadcast %cst_11 : f32 to vector<48x1xf32>
    %17 = vector.broadcast %12 : vector<48x1xf32> to vector<48x256xf32>
    %18 = arith.subf %9, %17 : vector<48x256xf32>
    %cst_12 = arith.constant 0.000000e+00 : f32
    %19 = vector.shape_cast %15 : vector<1x256xi1> to vector<1x256xi1>
    %20 = vector.broadcast %19 : vector<1x256xi1> to vector<48x256xi1>
    %21 = vector.broadcast %cst_12 : f32 to vector<48x256xf32>
    %22 = arith.select %20, %18, %21 : vector<48x256xi1>, vector<48x256xf32>
    %23 = arith.mulf %22, %22 : vector<48x256xf32>
    %cst_13 = arith.constant dense<0.000000e+00> : vector<48xf32>
    %24 = vector.multi_reduction <add>, %23, %cst_13 [1] : vector<48x256xf32> to vector<48xf32>
    %25 = vector.shape_cast %24 : vector<48xf32> to vector<48x1xf32>
    %26 = arith.addf %16, %25 : vector<48x1xf32>
    %cst_14 = arith.constant 0.00510204071 : f32
    %27 = vector.broadcast %cst_14 : f32 to vector<48x1xf32>
    %28 = arith.mulf %26, %27 : vector<48x1xf32>
    %cst_15 = arith.constant 9.99999974E-6 : f32
    %29 = vector.broadcast %cst_15 : f32 to vector<48x1xf32>
    %30 = arith.addf %28, %29 : vector<48x1xf32>
    %31 = math.rsqrt %30 : vector<48x1xf32>
    %32 = arith.mulf %1, %31 : vector<48x1xf32>
    %33 = arith.mulf %12, %32 : vector<48x1xf32>
    %34 = arith.subf %2, %33 : vector<48x1xf32>
    %35 = vector.broadcast %32 : vector<48x1xf32> to vector<48x256xf32>
    %36 = arith.mulf %9, %35 : vector<48x256xf32>
    %37 = vector.broadcast %34 : vector<48x1xf32> to vector<48x256xf32>
    %38 = arith.addf %36, %37 : vector<48x256xf32>
    %c0_16 = arith.constant 0 : index
    %c0_17 = arith.constant 0 : index
    %c0_18 = arith.constant 0 : index
    %39 = vector.load %arg3[%c0_16, %c0_17, %c0_18] : memref<1x48x256xf32, #tpu.memory_space<vmem>>, vector<1x48x256xf32>
    %40 = vector.shape_cast %39 : vector<1x48x256xf32> to vector<48x256xf32>
    %41 = vector.shape_cast %38 : vector<48x256xf32> to vector<1x48x256xf32>
    tpu.vector_store %arg3[%c0_16, %c0_17, %c0_18], %41 {strides = array<i32>} : memref<1x48x256xf32, #tpu.memory_space<vmem>>, vector<1x48x256xf32>,
    return
  }
}

</mosaic_0001>

<bundles_post_ra>
// kernel: conv2d_bn.1
= control target key start
LH: loop header
LB: loop body
LE: loop exit
PB: predicated region body
PF: predicated region fallthrough
CT: control target
= control target key end

     0   :  { %vm62_vm0 = vcmask 392192   ;;  %v562_v30 = vmov 0   ;;  %v192_v47 = vlaneseq  ;;  %s563_s21 = smov 1   ;;  %s807_s0 = inlined_call_operand.vmem [shape: f32[1,48,256], index: 0, kind: input, shape index: {}]   ;;  %s808_s1 = inlined_call_operand.vmem [shape: f32[48,48], index: 1, kind: input, shape index: {}]   ;;  %s809_s2 = inlined_call_operand.vmem [shape: f32[48,2], index: 2, kind: input, shape index: {}]   ;;  %s810_s3 = inlined_call_operand.vmem [shape: f32[1,48,256], index: 3, kind: output, shape index: {}]  }
   0x1   :  { %v36_v0 = vld [vmem:[%s807_s0 + $0x50] sm:$0xff]  ;;  %v37_v1 = vld [vmem:[%s807_s0 + $0x58] sm:$0xff]  ;;  %v34_v6 = vld [vmem:[%s807_s0 + $0x40] sm:$0xff]  ;;  %544 = vset.pattern.permute.xlu0 %v562_v30  ;;  %545 = vset.pattern.permute.xlu1 %v562_v30 }
   0x2   :  { %v32_v2 = vld [vmem:[%s807_s0 + $0x30] sm:$0xff]  ;;  %v53_v3 = vadd.f32 %v37_v1, %v36_v0  ;;  %v33_v4 = vld [vmem:[%s807_s0 + $0x38] sm:$0xff]  ;;  %91 = vmatpush.msra.mxu0 %v36_v0  ;;  %523 = vmatpush.msra.mxu3 %v36_v0  ;;  %v35_v10 = vld [vmem:[%s807_s0 + $0x48] sm:$0xff]  ;;  %v193_v50 = vand.u32 127, %v192_v47 }
   0x3   :  { %v47_v5 = vadd.f32 %v33_v4, %v32_v2  ;;  %v28_v7 = vld [vmem:[%s807_s0 + $0x10] sm:$0xff]  ;;  %v29_v8 = vld [vmem:[%s807_s0 + $0x18] sm:$0xff]  ;;  %529 = vmatpush.msra.mxu1 %v37_v1  ;;  %v30_v11 = vld [vmem:[%s807_s0 + $0x20] sm:$0xff]  ;;  %v50_v15 = vadd.f32 %v35_v10, %v34_v6  ;;  %546 = vset.pattern.permute.xlu2 %v562_v30 }
   0x4   :  { %54 = vadd.xlane.f32.xlu0 %v53_v3  ;;  %v41_v9 = vadd.f32 %v29_v8, %v28_v7  ;;  %92 = vmatpush.msra.mxu0 %v34_v6  ;;  %v31_v12 = vld [vmem:[%s807_s0 + $0x28] sm:$0xff]  ;;  %v26_v13 = vld [vmem:[%s807_s0] sm:$0xff]  ;;  %v16_v20 = vld [vmem:[%s808_s1 + $0x10] sm:$0xff]  ;;  %v194_v51 = vadd.s32 128, %v193_v50 }
   0x5   :  { %48 = vadd.xlane.f32.xlu1 %v47_v5  ;;  %524 = vmatpush.msra.mxu3 %v34_v6  ;;  %v27_v14 = vld [vmem:[%s807_s0 + $0x8] sm:$0xff]  ;;  %v44_v16 = vadd.f32 %v31_v12, %v30_v11  ;;  %v14_v18 = vld [vmem:[%s808_s1] sm:$0xff]  ;;  %v17_v23 = vld [vmem:[%s808_s1 + $0x18] sm:$0xff] }
   0x6   :  { %42 = vadd.xlane.f32.xlu2 %v41_v9  ;;  %93 = vmatpush.msra.mxu0 %v32_v2  ;;  %v38_v17 = vadd.f32 %v27_v14, %v26_v13  ;;  %v15_v19 = vld [vmem:[%s808_s1 + $0x8] sm:$0xff]  ;;  %v18_v26 = vld [vmem:[%s808_s1 + $0x20] sm:$0xff]  ;;  %vm196_vm1 = vcmp.lt.s32.totalorder %v194_v51, 196 }
   0x7   :  { %525 = vmatpush.msra.mxu3 %v32_v2  ;;  %530 = vmatpush.msra.mxu1 %v35_v10  ;;  %v19_v29 = vld [vmem:[%s808_s1 + $0x28] sm:$0xff] }
   0x8   :  { %94 = vmatpush.msra.mxu0 %v30_v11 }
   0x9   :  { %526 = vmatpush.msra.mxu3 %v30_v11  ;;  %531 = vmatpush.msra.mxu1 %v33_v4 }
   0xa   :  { %95 = vmatpush.msra.mxu0 %v28_v7 }
   0xb   :  { %527 = vmatpush.msra.mxu3 %v28_v7  ;;  %532 = vmatpush.msra.mxu1 %v31_v12 }
   0xc   :  { %51 = vadd.xlane.f32.xlu0 %v50_v15  ;;  %96 = vmatpush.msra.mxu0 %v26_v13 }
   0xd   :  { %45 = vadd.xlane.f32.xlu1 %v44_v16  ;;  %528 = vmatpush.msra.mxu3 %v26_v13 }
   0xe   :  { %126 = vmatpush.msrb.mxu0 %v37_v1  ;;  %39 = vadd.xlane.f32.xlu2 %v38_v17 }
   0xf   :  { %533 = vmatpush.msra.mxu1 %v29_v8  ;;  %505 = vmatmul.msk.f32.vlgmr.msra.gmra.mxu0 %vm62_vm0, %v14_v18 }
  0x10   :  { %127 = vmatpush.msrb.mxu0 %v35_v10  ;;  %506 = vmatmul.msk.f32.vlgmr.msra.gmra.mxu3 %vm62_vm0, %v15_v19 }
  0x11   :  { %534 = vmatpush.msra.mxu1 %v27_v14 }
  0x12   :  { %128 = vmatpush.msrb.mxu0 %v33_v4  ;;  %512 = vmatmul.msk.f32.vlgmr.msra.gmra.mxu1 %vm62_vm0, %v15_v19 }
  0x14   :  { %129 = vmatpush.msrb.mxu0 %v31_v12 }
  0x16   :  { %130 = vmatpush.msrb.mxu0 %v29_v8 }
  0x18   :  { %131 = vmatpush.msrb.mxu0 %v27_v14  ;;  %507 = vmatmul.msk.f32.gmra.mxu3 %vm62_vm0, %v16_v20 }
  0x19   :  { %511 = vmatmul.msk.f32.vlgmr.msrb.gmra.mxu0 %vm62_vm0, %v14_v18 }
  0x1a   :  { %513 = vmatmul.msk.f32.gmra.mxu1 %vm62_vm0, %v16_v20 }
  0x20   :  { %508 = vmatmul.msk.f32.gmra.mxu3 %vm62_vm0, %v17_v23 }
  0x22   :  { %514 = vmatmul.msk.f32.gmra.mxu1 %vm62_vm0, %v17_v23 }
  0x28   :  { %509 = vmatmul.msk.f32.gmra.mxu3 %vm62_vm0, %v18_v26 }
  0x2a   :  { %515 = vmatmul.msk.f32.gmra.mxu1 %vm62_vm0, %v18_v26 }
  0x30   :  { %510 = vmatmul.msk.f32.gmra.mxu3 %vm62_vm0, %v19_v29 }
  0x32   :  { %516 = vmatmul.msk.f32.gmra.mxu1 %vm62_vm0, %v19_v29 }
  0x77   :  { %v55_v21 = vpop.xlane.xlu0 %54 }
  0x78   :  { %161 = vmatpush.msra.mxu0 %v55_v21  ;;  %535 = vmatpush.msra.mxu2 %v55_v21  ;;  %v49_v22 = vpop.xlane.xlu1 %48 }
  0x79   :  { %v43_v24 = vpop.xlane.xlu2 %42 }
  0x7f   :  { %v52_v25 = vpop.xlane.xlu0 %51 }
  0x80   :  { %162 = vmatpush.msra.mxu0 %v52_v25  ;;  %536 = vmatpush.msra.mxu2 %v52_v25  ;;  %v46_v27 = vpop.xlane.xlu1 %45 }
  0x81   :  { %v40_v28 = vpop.xlane.xlu2 %39 }
  0x82   :  { %163 = vmatpush.msra.mxu0 %v49_v22  ;;  %537 = vmatpush.msra.mxu2 %v49_v22 }
  0x84   :  { %164 = vmatpush.msra.mxu0 %v46_v27  ;;  %538 = vmatpush.msra.mxu2 %v46_v27 }
  0x86   :  { %165 = vmatpush.msra.mxu0 %v43_v24  ;;  %539 = vmatpush.msra.mxu2 %v43_v24 }
  0x88   :  { %166 = vmatpush.msra.mxu0 %v40_v28  ;;  %540 = vmatpush.msra.mxu2 %v40_v28 }
  0x89   :  { %517 = vmatmul.msk.f32.vlgmr.msra.gmra.mxu0 %vm62_vm0, %v14_v18  ;;  %518 = vmatmul.msk.f32.vlgmr.msra.gmra.mxu2 %vm62_vm0, %v15_v19 }
  0x8c   :  { %v657_v31 = vpop.f32.mrf.mxu0 }
  0x8f   :  { %v681_v46 = vpop.f32.mrf.mxu1 }
  0x91   :  { %519 = vmatmul.msk.f32.gmra.mxu2 %vm62_vm0, %v16_v20 }
  0x93   :  { %v679_v45 = vpop.f32.mrf.mxu3 }
  0x96   :  { %v659_v32 = vpop.f32.mrf.mxu0 }
  0x97   :  { %v685_v49 = vpop.f32.mrf.mxu1 }
  0x99   :  { %520 = vmatmul.msk.f32.gmra.mxu2 %vm62_vm0, %v17_v23 }
  0x9b   :  { %v683_v48 = vpop.f32.mrf.mxu3 }
  0x9f   :  { %v691_v56 = vpop.f32.mrf.mxu1 }
  0xa1   :  { %521 = vmatmul.msk.f32.gmra.mxu2 %vm62_vm0, %v18_v26 }
  0xa3   :  { %v689_v55 = vpop.f32.mrf.mxu3 }
  0xa7   :  { %v698_v2 = vpop.f32.mrf.mxu1 }
  0xa9   :  { %522 = vmatmul.msk.f32.gmra.mxu2 %vm62_vm0, %v19_v29 }
  0xab   :  { %v696_v1 = vpop.f32.mrf.mxu3 }
  0xaf   :  { %v709_v19 = vpop.f32.mrf.mxu1 }
  0xb3   :  { %v707_v18 = vpop.f32.mrf.mxu3 }
 0x106   :  { %v168_v33 = vpop.f32.mrf.mxu0 }
 0x107   :  { %v661_v34 = vmul.f32 0.0051020407, %v168_v33 }
 0x109   :  { %199 = vperm.xlu0 %544, %v661_v34  }
 0x10c   :  { %v171_v35 = vpop.f32.mrf.mxu2 }
 0x10d   :  { %v664_v36 = vmul.f32 0.0051020407, %v171_v35 }
 0x10f   :  { %204 = vperm.xlu1 %545, %v664_v36  }
 0x114   :  { %v174_v37 = vpop.f32.mrf.mxu2 }
 0x115   :  { %v667_v38 = vmul.f32 0.0051020407, %v174_v37 }
 0x117   :  { %209 = vperm.xlu2 %546, %v667_v38  }
 0x11c   :  { %v177_v39 = vpop.f32.mrf.mxu2 }
 0x11d   :  { %v670_v40 = vmul.f32 0.0051020407, %v177_v39 }
 0x11f   :  { %214 = vperm.xlu2 %546, %v670_v40  }
 0x124   :  { %v180_v41 = vpop.f32.mrf.mxu2 }
 0x125   :  { %v673_v42 = vmul.f32 0.0051020407, %v180_v41 }
 0x127   :  { %219 = vperm.xlu1 %545, %v673_v42  }
 0x12c   :  { %v183_v43 = vpop.f32.mrf.mxu2 }
 0x12d   :  { %v676_v44 = vmul.f32 0.0051020407, %v183_v43 }
 0x12f   :  { %224 = vperm.xlu2 %546, %v676_v44  }
 0x171   :  { %v210_v52 = vpop.permute.xlu2 %209 }
 0x172   :  { %v231_v53 = vsub.f32 %v683_v48, %v210_v52  ;;  %v232_v54 = vsub.f32 %v685_v49, %v210_v52 }
 0x174   :  { %v259_v57 = vmul.f32 %v231_v53, %v231_v53  ;;  %v248_v58 = vsel %vm196_vm1, %v232_v54, 0.0 }
 0x175   :  { %v260_v59 = vmul.f32 %v248_v58, %v248_v58 }
 0x177   :  { %v273_v60 = vadd.f32 %v260_v59, %v259_v57 }
 0x179   :  { %274 = vadd.xlane.f32.xlu2 %v273_v60  ;;  %v215_v61 = vpop.permute.xlu2 %214 }
 0x17a   :  { %v234_v3 = vsub.f32 %v691_v56, %v215_v61  ;;  %v233_v7 = vsub.f32 %v689_v55, %v215_v61 }
 0x17b   :  { %v200_v62 = vpop.permute.xlu0 %199 }
 0x17c   :  { %v227_v63 = vsub.f32 %v657_v31, %v200_v62  ;;  %v228_v0 = vsub.f32 %v659_v32, %v200_v62  ;;  %v250_v12 = vsel %vm196_vm1, %v234_v3, 0.0  ;;  %v261_v15 = vmul.f32 %v233_v7, %v233_v7 }
 0x17d   :  { %v262_v17 = vmul.f32 %v250_v12, %v250_v12 }
 0x17e   :  { %v255_v4 = vmul.f32 %v227_v63, %v227_v63  ;;  %v244_v5 = vsel %vm196_vm1, %v228_v0, 0.0 }
 0x17f   :  { %v256_v6 = vmul.f32 %v244_v5, %v244_v5  ;;  %v276_v22 = vadd.f32 %v262_v17, %v261_v15  ;;  %v720_v5 = vld [vmem:[%s809_s2 + $0x10] sm:$0xff] }
 0x181   :  { %v205_v8 = vpop.permute.xlu1 %204  ;;  %v267_v9 = vadd.f32 %v256_v6, %v255_v4 }
 0x182   :  { %v229_v10 = vsub.f32 %v679_v45, %v205_v8  ;;  %v230_v11 = vsub.f32 %v681_v46, %v205_v8 }
 0x183   :  { %268 = vadd.xlane.f32.xlu1 %v267_v9 }
 0x184   :  { %v257_v13 = vmul.f32 %v229_v10, %v229_v10  ;;  %v246_v14 = vsel %vm196_vm1, %v230_v11, 0.0 }
 0x185   :  { %v258_v16 = vmul.f32 %v246_v14, %v246_v14 }
 0x187   :  { %v270_v20 = vadd.f32 %v258_v16, %v257_v13 }
 0x189   :  { %v225_v21 = vpop.permute.xlu2 %224  ;;  %271 = vadd.xlane.f32.xlu0 %v270_v20 }
 0x18a   :  { %v237_v23 = vsub.f32 %v707_v18, %v225_v21  ;;  %v238_v24 = vsub.f32 %v709_v19, %v225_v21 }
 0x18b   :  { %277 = vadd.xlane.f32.xlu1 %v276_v22 }
 0x18c   :  { %v265_v25 = vmul.f32 %v237_v23, %v237_v23  ;;  %v254_v26 = vsel %vm196_vm1, %v238_v24, 0.0 }
 0x18d   :  { %v266_v27 = vmul.f32 %v254_v26, %v254_v26  ;;  %v731_v26 = vld [vmem:[%s809_s2] sm:$0xff] }
 0x18f   :  { %v282_v28 = vadd.f32 %v266_v27, %v265_v25 }
 0x191   :  { %283 = vadd.xlane.f32.xlu0 %v282_v28 }
 0x199   :  { %v220_v29 = vpop.permute.xlu1 %219 }
 0x19a   :  { %v235_v30 = vsub.f32 %v696_v1, %v220_v29  ;;  %v236_v33 = vsub.f32 %v698_v2, %v220_v29 }
 0x19c   :  { %v263_v35 = vmul.f32 %v235_v30, %v235_v30  ;;  %v252_v37 = vsel %vm196_vm1, %v236_v33, 0.0 }
 0x19d   :  { %v264_v39 = vmul.f32 %v252_v37, %v252_v37 }
 0x19f   :  { %v279_v41 = vadd.f32 %v264_v39, %v263_v35 }
 0x1a1   :  { %280 = vadd.xlane.f32.xlu2 %v279_v41 }
 0x1ec   :  { %v275_v43 = vpop.xlane.xlu2 %274 }
 0x1ed   :  { %v293_v47 = vmul.f32 0.0051020407, %v275_v43 }
 0x1ef   :  { %v299_v50 = vadd.f32 1e-05, %v293_v47  ;;  %v21_v47 = vld [vmem:[%s809_s2 + $0x8] sm:$0xff] }
 0x1f1   :  { %550 = vrsqrt.f32 %v299_v50  ;;  %vm329_vm2 = vweird.f32 %v299_v50 }
 0x1f6   :  { %v269_v52 = vpop.xlane.xlu1 %268 }
 0x1f7   :  { %v551_v53 = vpop.eup %550  ;;  %v291_v54 = vmul.f32 0.0051020407, %v269_v52 }
 0x1f8   :  { %v324_v57 = vmul.f32 %v551_v53, %v299_v50  ;;  %vm330_vm3 = vweird.f32 %v551_v53 }
 0x1f9   :  { %v297_v58 = vadd.f32 1e-05, %v291_v54  ;;  %vm331_vm4 = vmor %vm329_vm2, %vm330_vm3  ;;  %v23_v54 = vld [vmem:[%s809_s2 + $0x18] sm:$0xff] }
 0x1fa   :  { %v325_v59 = vmul.f32 %v551_v53, %v324_v57 }
 0x1fb   :  { %552 = vrsqrt.f32 %v297_v58  ;;  %vm309_vm6 = vweird.f32 %v297_v58 }
 0x1fc   :  { %v326_v60 = vmul.f32 0.5, %v325_v59  ;;  %v272_v61 = vpop.xlane.xlu0 %271 }
 0x1fd   :  { %v292_v62 = vmul.f32 0.0051020407, %v272_v61 }
 0x1fe   :  { %v327_v63 = vsub.f32 1.5, %v326_v60  ;;  %v278_v51 = vpop.xlane.xlu1 %277 }
 0x1ff   :  { %v298_v0 = vadd.f32 1e-05, %v292_v62  ;;  %v294_v3 = vmul.f32 0.0051020407, %v278_v51 }
 0x200   :  { %v328_v4 = vmul.f32 %v551_v53, %v327_v63 }
 0x201   :  { %v553_v6 = vpop.eup %552  ;;  %554 = vrsqrt.f32 %v298_v0  ;;  %v300_v7 = vadd.f32 1e-05, %v294_v3  ;;  %vm319_vm9 = vweird.f32 %v298_v0 }
 0x202   :  { %v304_v8 = vmul.f32 %v553_v6, %v297_v58  ;;  %v332_v9 = vsel %vm331_vm4, %v551_v53, %v328_v4  ;;  %vm310_vm5 = vweird.f32 %v553_v6  ;;  %v25_v4 = vld [vmem:[%s809_s2 + $0x28] sm:$0xff] }
 0x203   :  { %556 = vrsqrt.f32 %v300_v7  ;;  %v723_v10 = vmul.f32 %v332_v9, %v720_v5  ;;  %vm311_vm7 = vmor %vm309_vm6, %vm310_vm5  ;;  %vm339_vm12 = vweird.f32 %v300_v7 }
 0x204   :  { %v305_v11 = vmul.f32 %v553_v6, %v304_v8  ;;  %v284_v12 = vpop.xlane.xlu0 %283 }
 0x205   :  { %v296_v13 = vmul.f32 0.0051020407, %v284_v12  ;;  %v371_v14 = vmul.f32 %v723_v10, %v667_v38 }
 0x206   :  { %v306_v15 = vmul.f32 0.5, %v305_v11 }
 0x207   :  { %v555_v16 = vpop.eup %554  ;;  %v302_v17 = vadd.f32 1e-05, %v296_v13  ;;  %385 = vrot.lane.b32.xlu0 %v371_v14, %s563_s21  ;;  %v24_v14 = vld [vmem:[%s809_s2 + $0x20] sm:$0xff] }
 0x208   :  { %v307_v20 = vsub.f32 1.5, %v306_v15  ;;  %v314_v21 = vmul.f32 %v555_v16, %v298_v0  ;;  %vm320_vm8 = vweird.f32 %v555_v16 }
 0x209   :  { %v557_v22 = vpop.eup %556  ;;  %558 = vrsqrt.f32 %v302_v17  ;;  %vm321_vm11 = vmor %vm319_vm9, %vm320_vm8  ;;  %vm359_vm15 = vweird.f32 %v302_v17 }
 0x20a   :  { %v308_v23 = vmul.f32 %v553_v6, %v307_v20  ;;  %v315_v24 = vmul.f32 %v555_v16, %v314_v21  ;;  %v334_v25 = vmul.f32 %v557_v22, %v300_v7  ;;  %vm340_vm10 = vweird.f32 %v557_v22 }
 0x20b   :  { %vm341_vm13 = vmor %vm339_vm12, %vm340_vm10 }
 0x20c   :  { %v316_v38 = vmul.f32 0.5, %v315_v24  ;;  %v335_v27 = vmul.f32 %v557_v22, %v334_v25  ;;  %v312_v28 = vsel %vm311_vm7, %v553_v6, %v308_v23 }
 0x20d   :  { %v363_v29 = vmul.f32 %v312_v28, %v731_v26 }
 0x20e   :  { %v317_v30 = vsub.f32 1.5, %v316_v38  ;;  %v336_v33 = vmul.f32 0.5, %v335_v27 }
 0x20f   :  { %v559_v35 = vpop.eup %558  ;;  %v369_v37 = vmul.f32 %v363_v29, %v661_v34 }
 0x210   :  { %v318_v39 = vmul.f32 %v555_v16, %v317_v30  ;;  %v337_v41 = vsub.f32 1.5, %v336_v33  ;;  %v354_v43 = vmul.f32 %v559_v35, %v302_v17  ;;  %vm360_vm14 = vweird.f32 %v559_v35 }
 0x211   :  { %381 = vrot.lane.b32.xlu1 %v369_v37, %s563_s21  ;;  %vm361_vm0 = vmor %vm359_vm15, %vm360_vm14  ;;  %v564_v17 = vmov 1  }
 0x212   :  { %v338_v50 = vmul.f32 %v557_v22, %v337_v41  ;;  %v355_v52 = vmul.f32 %v559_v35, %v354_v43  ;;  %v322_v53 = vsel %vm321_vm11, %v555_v16, %v318_v39 }
 0x213   :  { %v364_v34 = vmul.f32 %v322_v53, %v21_v47 }
 0x214   :  { %v356_v57 = vmul.f32 0.5, %v355_v52  ;;  %v281_v58 = vpop.xlane.xlu2 %280  ;;  %v342_v59 = vsel %vm341_vm13, %v557_v22, %v338_v50 }
 0x215   :  { %v295_v60 = vmul.f32 0.0051020407, %v281_v58  ;;  %v370_v61 = vmul.f32 %v364_v34, %v664_v36  ;;  %v366_v62 = vmul.f32 %v342_v59, %v23_v54 }
 0x216   :  { %v357_v63 = vsub.f32 1.5, %v356_v57 }
 0x217   :  { %v301_v51 = vadd.f32 1e-05, %v295_v60  ;;  %383 = vrot.lane.b32.xlu2 %v370_v61, %s563_s21  ;;  %v372_v0 = vmul.f32 %v366_v62, %v670_v40 }
 0x218   :  { %v358_v3 = vmul.f32 %v559_v35, %v357_v63 }
 0x219   :  { %560 = vrsqrt.f32 %v301_v51  ;;  %387 = vrot.lane.b32.xlu1 %v372_v0, %s563_s21  ;;  %vm349_vm2 = vweird.f32 %v301_v51 }
 0x21a   :  { %v362_v6 = vsel %vm361_vm0, %v559_v35, %v358_v3 }
 0x21b   :  { %v368_v36 = vmul.f32 %v362_v6, %v25_v4 }
 0x21d   :  { %v374_v7 = vmul.f32 %v368_v36, %v676_v44 }
 0x21f   :  { %v561_v8 = vpop.eup %560  ;;  %391 = vrot.lane.b32.xlu2 %v374_v7, %s563_s21 }
 0x220   :  { %v344_v9 = vmul.f32 %v561_v8, %v301_v51  ;;  %vm350_vm1 = vweird.f32 %v561_v8 }
 0x221   :  { %407 = vperm.xlu1 %545, %v363_v29   ;;  %vm351_vm3 = vmor %vm349_vm2, %vm350_vm1 }
 0x222   :  { %v345_v40 = vmul.f32 %v561_v8, %v344_v9 }
 0x224   :  { %v346_v11 = vmul.f32 0.5, %v345_v40 }
 0x226   :  { %v347_v12 = vsub.f32 1.5, %v346_v11 }
 0x227   :  { %417 = vperm.xlu2 %546, %v723_v10  }
 0x228   :  { %v348_v13 = vmul.f32 %v561_v8, %v347_v12 }
 0x229   :  { %422 = vperm.xlu1 %545, %v366_v62  }
 0x22a   :  { %v352_v44 = vsel %vm351_vm3, %v561_v8, %v348_v13 }
 0x22b   :  { %v367_v15 = vmul.f32 %v352_v44, %v24_v14 }
 0x22d   :  { %v373_v16 = vmul.f32 %v367_v15, %v673_v42 }
 0x22f   :  { %389 = vrot.lane.b32.xlu0 %v373_v16, %s563_s21  ;;  %432 = vperm.xlu2 %546, %v368_v36  }
 0x231   :  { %547 = vset.pattern.permute.xlu1 %v564_v17 }
 0x237   :  { %412 = vperm.xlu0 %544, %v364_v34   ;;  %549 = vset.pattern.permute.xlu2 %v564_v17 }
 0x23f   :  { %427 = vperm.xlu0 %544, %v367_v15  }
 0x247   :  { %548 = vset.pattern.permute.xlu0 %v564_v17 }
 0x271   :  { %v384_v10 = vpop.permute.xlu2 %383 }
 0x272   :  { %v400_v20 = vsub.f32 %v21_v47, %v384_v10 }
 0x274   :  { %454 = vperm.xlu0 %548, %v400_v20  }
 0x279   :  { %v386_v21 = vpop.permute.xlu0 %385  ;;  %v392_v38 = vpop.permute.xlu2 %391 }
 0x27a   :  { %v401_v22 = vsub.f32 %v720_v5, %v386_v21  ;;  %v404_v27 = vsub.f32 %v25_v4, %v392_v38 }
 0x27c   :  { %459 = vperm.xlu2 %549, %v401_v22  }
 0x281   :  { %v418_v30 = vpop.permute.xlu2 %417 }
 0x282   :  { %v439_v37 = vmul.f32 %v418_v30, %v683_v48  ;;  %v440_v5 = vmul.f32 %v418_v30, %v685_v49 }
 0x283   :  { %v382_v23 = vpop.permute.xlu1 %381 }
 0x284   :  { %v399_v24 = vsub.f32 %v731_v26, %v382_v23 }
 0x286   :  { %449 = vperm.xlu1 %547, %v399_v24  }
 0x289   :  { %v433_v33 = vpop.permute.xlu2 %432 }
 0x28b   :  { %v388_v42 = vpop.permute.xlu1 %387 }
 0x28c   :  { %v402_v25 = vsub.f32 %v23_v54, %v388_v42 }
 0x28e   :  { %464 = vperm.xlu1 %547, %v402_v25  }
 0x293   :  { %v408_v52 = vpop.permute.xlu1 %407 }
 0x294   :  { %v435_v34 = vmul.f32 %v408_v52, %v657_v31  ;;  %v436_v57 = vmul.f32 %v408_v52, %v659_v32 }
 0x296   :  { %474 = vperm.xlu1 %547, %v404_v27  }
 0x29b   :  { %v423_v54 = vpop.permute.xlu1 %422 }
 0x29c   :  { %v441_v31 = vmul.f32 %v423_v54, %v689_v55  ;;  %v442_v32 = vmul.f32 %v423_v54, %v691_v56  ;;  %v445_v55 = vmul.f32 %v433_v33, %v707_v18  ;;  %v446_v56 = vmul.f32 %v433_v33, %v709_v19 }
 0x2a1   :  { %v390_v28 = vpop.permute.xlu0 %389 }
 0x2a2   :  { %v403_v29 = vsub.f32 %v24_v14, %v390_v28 }
 0x2a4   :  { %469 = vperm.xlu2 %549, %v403_v29  }
 0x2a9   :  { %v413_v35 = vpop.permute.xlu0 %412 }
 0x2aa   :  { %v437_v47 = vmul.f32 %v413_v35, %v679_v45  ;;  %v438_v50 = vmul.f32 %v413_v35, %v681_v46 }
 0x2b1   :  { %v428_v43 = vpop.permute.xlu0 %427 }
 0x2b2   :  { %v443_v59 = vmul.f32 %v428_v43, %v696_v1  ;;  %v444_v60 = vmul.f32 %v428_v43, %v698_v2 }
 0x2d6   :  { %v460_v39 = vpop.permute.xlu2 %459 }
 0x2d7   :  { %v481_v41 = vadd.f32 %v460_v39, %v439_v37  ;;  %v482_v26 = vadd.f32 %v460_v39, %v440_v5 }
 0x2d9   :  { %493 = vst [vmem:[%s810_s3 + $0x20] sm:$0xff] %v481_v41 }
 0x2da   :  { %494 = vst [vmem:[%s810_s3 + $0x28] sm:$0xff] %v482_v26 }
 0x2e6   :  { %v455_v48 = vpop.permute.xlu0 %454 }
 0x2e7   :  { %v479_v53 = vadd.f32 %v455_v48, %v437_v47  ;;  %v480_v49 = vadd.f32 %v455_v48, %v438_v50 }
 0x2e9   :  { %491 = vst [vmem:[%s810_s3 + $0x10] sm:$0xff] %v479_v53 }
 0x2ea   :  { %492 = vst [vmem:[%s810_s3 + $0x18] sm:$0xff] %v480_v49 }
 0x2f8   :  { %v450_v45 = vpop.permute.xlu1 %449 }
 0x2f9   :  { %v477_v58 = vadd.f32 %v450_v45, %v435_v34  ;;  %v478_v46 = vadd.f32 %v450_v45, %v436_v57 }
 0x2fb   :  { %489 = vst [vmem:[%s810_s3] sm:$0xff] %v477_v58 }
 0x2fc   :  { %490 = vst [vmem:[%s810_s3 + $0x8] sm:$0xff] %v478_v46 }
 0x2fe   :  { %v470_v61 = vpop.permute.xlu2 %469 }
 0x2ff   :  { %v485_v62 = vadd.f32 %v470_v61, %v443_v59  ;;  %v486_v63 = vadd.f32 %v470_v61, %v444_v60 }
 0x300   :  { %v465_v51 = vpop.permute.xlu1 %464 }
 0x301   :  { %497 = vst [vmem:[%s810_s3 + $0x40] sm:$0xff] %v485_v62  ;;  %v483_v0 = vadd.f32 %v465_v51, %v441_v31  ;;  %v484_v3 = vadd.f32 %v465_v51, %v442_v32 }
 0x302   :  { %498 = vst [vmem:[%s810_s3 + $0x48] sm:$0xff] %v486_v63 }
 0x303   :  { %495 = vst [vmem:[%s810_s3 + $0x30] sm:$0xff] %v483_v0 }
 0x304   :  { %496 = vst [vmem:[%s810_s3 + $0x38] sm:$0xff] %v484_v3 }
 0x308   :  { %v475_v1 = vpop.permute.xlu1 %474 }
 0x309   :  { %v487_v2 = vadd.f32 %v475_v1, %v445_v55  ;;  %v488_v4 = vadd.f32 %v475_v1, %v446_v56 }
 0x30b   :  { %499 = vst [vmem:[%s810_s3 + $0x50] sm:$0xff] %v487_v2 }
 0x30c   :  { %500 = vst [vmem:[%s810_s3 + $0x58] sm:$0xff] %v488_v4 }

</bundles_post_ra>
